<compile_context>
chip_gen: v7x
topology: tpu7x:2x2x1
jax: 0.10.0
libtpu: 0.0.40
codegen_flags: <defaults>
</compile_context>

<pallas_src>
import functools

import jax
import jax.numpy as jnp
from jax.experimental import pallas as pl
from jax.experimental.pallas import tpu as pltpu

_LN_EPS = 1e-5
_FALLBACK_VMEM_BYTES = 64 * 1024 * 1024   # v7x per-TensorCore VMEM (most restrictive)


def _round_up(v, m):
    return ((v + m - 1) // m) * m


def _vmem_capacity_bytes():
    try:
        return int(pltpu.get_tpu_info().vmem_capacity_bytes)
    except Exception:
        return _FALLBACK_VMEM_BYTES


def _gelu_f32(x, approximate):
    # PyTorch nn.GELU() default is the exact (erf) formulation. approximate=True (tanh)
    # routes the transcendental to the EUP slot (cheaper, esp. on v5e) but changes
    # numerics vs. the PyTorch reference, so it is off by default.
    if approximate:
        return jax.nn.gelu(x, approximate=True)
    return x * 0.5 * (1.0 + jax.lax.erf(x * 0.7071067811865476))


def _epilogue(x_f32, out_f32, gamma, ln_w, ln_b, dim_valid):
    """residual + layerscale*out, then LayerNorm over the (possibly padded) last axis.

    Two-pass statistics (matches PyTorch nn.LayerNorm). Padded feature lanes of y are
    exactly zero (zero-padded inputs / weights); they are masked out of the variance so
    the statistics are taken over the original `dim_valid` features only.
    """
    y = x_f32 + gamma * out_f32
    dim_pad = y.shape[-1]
    inv_d = 1.0 / float(dim_valid)
    mean = jnp.sum(y, axis=-1, keepdims=True) * inv_d      # padded lanes contribute 0
    yc = y - mean
    if dim_pad != dim_valid:
        lane = jax.lax.broadcasted_iota(jnp.int32, (1, dim_pad), 1)
        yc_stat = jnp.where(lane < dim_valid, yc, 0.0)
    else:
        yc_stat = yc
    var = jnp.sum(yc_stat * yc_stat, axis=-1, keepdims=True) * inv_d
    inv = jax.lax.rsqrt(var + _LN_EPS)
    return yc * inv * ln_w + ln_b


def _resident_kernel(x_ref, w1_ref, b1_ref, w2_ref, b2_ref,
                     gamma_ref, ln_w_ref, ln_b_ref, o_ref,
                     *, dim_valid, approx_gelu):
    x = x_ref[...]
    # fc1: MXU in native dtype, f32 accumulation.
    h = jnp.dot(x, w1_ref[...], preferred_element_type=jnp.float32)
    h = _gelu_f32(h + b1_ref[...].astype(jnp.float32), approx_gelu)
    # TODO(synk): dropout is identity (eval mode); train-mode dropout would need pltpu.prng_*.
    out = jnp.dot(h.astype(w2_ref.dtype), w2_ref[...],
                  preferred_element_type=jnp.float32)
    out = out + b2_ref[...].astype(jnp.float32)
    o = _epilogue(x.astype(jnp.float32), out,
                  gamma_ref[...].astype(jnp.float32),
                  ln_w_ref[...].astype(jnp.float32),
                  ln_b_ref[...].astype(jnp.float32),
                  dim_valid)
    o_ref[...] = o.astype(o_ref.dtype)


def _streaming_kernel(x_ref, w1_ref, b1_ref, w2_ref, b2_ref,
                      gamma_ref, ln_w_ref, ln_b_ref, o_ref, acc_ref,
                      *, dim_valid, approx_gelu):
    k = pl.program_id(1)

    @pl.when(k == 0)
    def _():
        acc_ref[...] = jnp.zeros_like(acc_ref)

    x = x_ref[...]
    h = jnp.dot(x, w1_ref[...], preferred_element_type=jnp.float32)
    h = _gelu_f32(h + b1_ref[...].astype(jnp.float32), approx_gelu)
    acc_ref[...] += jnp.dot(h.astype(w2_ref.dtype), w2_ref[...],
                            preferred_element_type=jnp.float32)

    @pl.when(k == pl.num_programs(1) - 1)
    def _():
        out = acc_ref[...] + b2_ref[...].astype(jnp.float32)
        o = _epilogue(x.astype(jnp.float32), out,
                      gamma_ref[...].astype(jnp.float32),
                      ln_w_ref[...].astype(jnp.float32),
                      ln_b_ref[...].astype(jnp.float32),
                      dim_valid)
        o_ref[...] = o.astype(o_ref.dtype)


def _plan(N, dim_pad, hidden_pad, itemsize, tn, th, force_stream):
    """Pick (stream?, TN, TH, vmem_limit) from the chip's VMEM capacity."""
    vmem_cap = _vmem_capacity_bytes()
    budget = int(vmem_cap * 0.80)   # leave headroom for Mosaic internal scratch / semaphores

    weight_bytes = 2 * dim_pad * hidden_pad * itemsize        # resident w1 + w2 (single copy)
    small_bytes = (hidden_pad + 5 * dim_pad) * itemsize       # b1, b2, layerscale, ln_w, ln_b

    # Stream weight chunks when a resident copy would eat most of the budget (v7x: 64 MiB).
    stream = bool(force_stream) or (weight_bytes + small_bytes > int(budget * 0.6))

    # Hidden-chunk width: multiple of 128 that divides hidden_pad (hidden_pad is a mult of 128).
    TH = min(_round_up(th, 128), hidden_pad)
    while hidden_pad % TH:
        TH -= 128

    n8 = _round_up(N, 8)

    def step_bytes(TN):
        b = small_bytes
        b += 2 * 2 * TN * dim_pad * itemsize            # x / out tiles, double-buffered
        b += 4 * TN * dim_pad * 4                       # f32 epilogue temporaries
        if stream:
            b += 2 * 2 * dim_pad * TH * itemsize        # w1 / w2 chunks, double-buffered
            b += TN * dim_pad * 4                       # f32 accumulator scratch
            b += TN * TH * 4                            # f32 fc1 / GELU intermediate
        else:
            b += weight_bytes                           # single-copy resident weights
            b += TN * hidden_pad * 4                    # f32 fc1 / GELU intermediate
        return b

    candidates = (tn,) if tn is not None else (512, 256, 128, 64, 32, 16, 8)
    TN = _round_up(min(candidates[-1], n8), 8)
    for cand in candidates:
        c = _round_up(min(cand, n8), 8)
        if step_bytes(c) <= budget:
            TN = c
            break

    vmem_limit = min(max(2 * step_bytes(TN), 32 * 1024 * 1024), budget)
    return stream, TN, TH, int(vmem_limit)


def residual_mlp_block(x, w1, b1, w2, b2, layerscale, ln_w, ln_b,
                       *, tn=None, th=512, approx_gelu=False, force_stream=False):
    """Forward pass of ResidualMLPBlock (eval mode).

    x: [N, dim]. w1: [dim, hidden], w2: [hidden, dim] (transposed vs. PyTorch [out, in]
    Linear storage). For the dim == hidden "fc2 = Identity" configuration, pass w2 = I,
    b2 = 0. Returns [N, dim].
    """
    N, dim = x.shape
    hidden = w1.shape[1]
    dtype = x.dtype
    itemsize = jnp.dtype(dtype).itemsize

    # ---- pad feature dims to lane multiples (128) for dense stores / full MXU tiles ----
    dim_pad = _round_up(dim, 128)
    hidden_pad = _round_up(hidden, 128)

    stream, TN, TH, vmem_limit = _plan(N, dim_pad, hidden_pad, itemsize, tn, th, force_stream)
    N_pad = _round_up(N, TN)

    if N_pad != N or dim_pad != dim:
        x_in = jnp.pad(x, ((0, N_pad - N), (0, dim_pad - dim)))
    else:
        x_in = x

    def pad_mat(a, r, c):
        return a if a.shape == (r, c) else jnp.pad(a, ((0, r - a.shape[0]), (0, c - a.shape[1])))

    def pad_vec(v, c):
        v2 = v.reshape(1, -1)
        return v2 if v2.shape[1] == c else jnp.pad(v2, ((0, 0), (0, c - v2.shape[1])))

    w1p = pad_mat(w1, dim_pad, hidden_pad)
    w2p = pad_mat(w2, hidden_pad, dim_pad)
    b1p = pad_vec(b1, hidden_pad)
    b2p = pad_vec(b2, dim_pad)
    gammap = pad_vec(layerscale, dim_pad)
    ln_wp = pad_vec(ln_w, dim_pad)
    ln_bp = pad_vec(ln_b, dim_pad)

    cost = pl.CostEstimate(
        flops=int(4 * N_pad * dim_pad * hidden_pad),           # two GEMMs, 2 flops / MAC
        transcendentals=int(N_pad * hidden_pad),               # erf / tanh in GELU
        bytes_accessed=int((2 * N_pad * dim_pad + 2 * dim_pad * hidden_pad
                            + hidden_pad + 5 * dim_pad) * itemsize),
    )
    compiler_params = pltpu.CompilerParams(
        dimension_semantics=("parallel",) if not stream else ("parallel", "arbitrary"),
        vmem_limit_bytes=vmem_limit,
    )

    # Single-copy (non-pipelined) VMEM residency for operands whose block never changes.
    vmem_full = pl.BlockSpec(memory_space=pltpu.MemorySpace.VMEM)

    if not stream:
        kernel = functools.partial(_resident_kernel, dim_valid=dim, approx_gelu=approx_gelu)
        tok_spec = pl.BlockSpec((TN, dim_pad), lambda i: (i, 0))
        out = pl.pallas_call(
            kernel,
            out_shape=jax.ShapeDtypeStruct((N_pad, dim_pad), dtype),
            grid_spec=pltpu.PrefetchScalarGridSpec(
                num_scalar_prefetch=0,
                grid=(N_pad // TN,),
                in_specs=[
                    tok_spec,        # x tile (pipelined; bump to pl.Buffered(3) for tiny-hidden configs)
                    vmem_full,       # w1   (VMEM-resident, single copy)
                    vmem_full,       # b1
                    vmem_full,       # w2   (VMEM-resident, single copy)
                    vmem_full,       # b2
                    vmem_full,       # layerscale
                    vmem_full,       # ln weight
                    vmem_full,       # ln bias
                ],
                out_specs=tok_spec,
            ),
            compiler_params=compiler_params,
            cost_estimate=cost,
        )(x_in, w1p, b1p, w2p, b2p, gammap, ln_wp, ln_bp)
    else:
        kernel = functools.partial(_streaming_kernel, dim_valid=dim, approx_gelu=approx_gelu)
        tok_spec = pl.BlockSpec((TN, dim_pad), lambda i, k: (i, 0))
        out = pl.pallas_call(
            kernel,
            out_shape=jax.ShapeDtypeStruct((N_pad, dim_pad), dtype),
            grid_spec=pltpu.PrefetchScalarGridSpec(
                num_scalar_prefetch=0,
                grid=(N_pad // TN, hidden_pad // TH),
                in_specs=[
                    tok_spec,                                          # x (resident across k)
                    pl.BlockSpec((dim_pad, TH), lambda i, k: (0, k)),  # w1 column chunk
                    pl.BlockSpec((1, TH), lambda i, k: (0, k)),        # b1 chunk
                    pl.BlockSpec((TH, dim_pad), lambda i, k: (k, 0)),  # w2 row chunk
                    vmem_full,                                         # b2
                    vmem_full,                                         # layerscale
                    vmem_full,                                         # ln weight
                    vmem_full,                                         # ln bias
                ],
                out_specs=tok_spec,
                scratch_shapes=[pltpu.VMEM((TN, dim_pad), jnp.float32)],
            ),
            compiler_params=compiler_params,
            cost_estimate=cost,
        )(x_in, w1p, b1p, w2p, b2p, gammap, ln_wp, ln_bp)

    return out[:N, :dim]


def _ref_forward(x, w1, b1, w2, b2, layerscale, ln_w, ln_b):
    # Pure-JAX reference (matches the PyTorch module in eval mode).
    h = jax.nn.gelu(x @ w1 + b1, approximate=False)
    out = h @ w2 + b2
    y = x + layerscale * out
    mean = y.mean(-1, keepdims=True)
    var = ((y - mean) ** 2).mean(-1, keepdims=True)
    return (y - mean) / jnp.sqrt(var + _LN_EPS) * ln_w + ln_b


if __name__ == "__main__":
    key = jax.random.PRNGKey(0)
    batch, seq, dim = 2, 8, 32
    hidden = dim * 4          # expansion_factor = 4
    N = batch * seq

    k_x, k_w1, k_b1, k_w2, k_b2 = jax.random.split(key, 5)
    x = jax.random.normal(k_x, (N, dim), dtype=jnp.float32)
    w1 = jax.random.normal(k_w1, (dim, hidden), dtype=jnp.float32) * 0.05
    b1 = jax.random.normal(k_b1, (hidden,), dtype=jnp.float32) * 0.01
    w2 = jax.random.normal(k_w2, (hidden, dim), dtype=jnp.float32) * 0.05
    b2 = jax.random.normal(k_b2, (dim,), dtype=jnp.float32) * 0.01
    layerscale = jnp.ones((dim,), jnp.float32) * 1e-6
    ln_w = jnp.ones((dim,), jnp.float32)
    ln_b = jnp.zeros((dim,), jnp.float32)

    # ---- default (VMEM-resident weights) path ----
    ref = _ref_forward(x, w1, b1, w2, b2, layerscale, ln_w, ln_b)
    out = jax.jit(residual_mlp_block)(x, w1, b1, w2, b2, layerscale, ln_w, ln_b)
    out = jax.block_until_ready(out)
    assert out.shape == (N, dim)
    assert jnp.allclose(out, ref, atol=1e-4, rtol=1e-4), "resident path mismatch vs reference"

    # ---- weight-streaming fallback path (exercises hidden padding + multi-chunk accumulation) ----
    hidden2 = 320   # pads to 384 -> 3 chunks of 128
    k2w1, k2b1, k2w2 = jax.random.split(jax.random.PRNGKey(1), 3)
    w1b = jax.random.normal(k2w1, (dim, hidden2), jnp.float32) * 0.05
    b1b = jax.random.normal(k2b1, (hidden2,), jnp.float32) * 0.01
    w2b = jax.random.normal(k2w2, (hidden2, dim), jnp.float32) * 0.05
    ref2 = _ref_forward(x, w1b, b1b, w2b, b2, layerscale, ln_w, ln_b)
    out2 = jax.jit(functools.partial(residual_mlp_block, force_stream=True, th=128))(
        x, w1b, b1b, w2b, b2, layerscale, ln_w, ln_b)
    out2 = jax.block_until_ready(out2)
    assert out2.shape == (N, dim)
    assert jnp.allclose(out2, ref2, atol=1e-4, rtol=1e-4), "streaming path mismatch vs reference"

    print("KERNEL_OK")
</pallas_src>

<mosaic_0001>
module attributes {stable_mosaic.version = 11 : i64} {
  func.func @_resident_kernel(%arg0: i32, %arg1: memref<16x128xf32, #tpu.memory_space<vmem>>, %arg2: memref<128x128xf32, #tpu.memory_space<vmem>>, %arg3: memref<1x128xf32, #tpu.memory_space<vmem>>, %arg4: memref<128x128xf32, #tpu.memory_space<vmem>>, %arg5: memref<1x128xf32, #tpu.memory_space<vmem>>, %arg6: memref<1x128xf32, #tpu.memory_space<vmem>>, %arg7: memref<1x128xf32, #tpu.memory_space<vmem>>, %arg8: memref<1x128xf32, #tpu.memory_space<vmem>>, %arg9: memref<16x128xf32, #tpu.memory_space<vmem>>) attributes {dimension_semantics = [#tpu.dimension_semantics<parallel>], iteration_bounds = array<i64: 1>, scalar_prefetch = 0 : i64, scratch_operands = 0 : i64, tpu.core_type = #tpu.core_type<tc>, window_params = [{transform_indices = @transform_0, window_bounds = array<i64: 16, 128>}, {pipeline_mode = #tpu.pipeline_mode<synchronous>, transform_indices = @transform_1, window_bounds = array<i64: 128, 128>}, {pipeline_mode = #tpu.pipeline_mode<synchronous>, transform_indices = @transform_2, window_bounds = array<i64: 1, 128>}, {pipeline_mode = #tpu.pipeline_mode<synchronous>, transform_indices = @transform_3, window_bounds = array<i64: 128, 128>}, {pipeline_mode = #tpu.pipeline_mode<synchronous>, transform_indices = @transform_4, window_bounds = array<i64: 1, 128>}, {pipeline_mode = #tpu.pipeline_mode<synchronous>, transform_indices = @transform_5, window_bounds = array<i64: 1, 128>}, {pipeline_mode = #tpu.pipeline_mode<synchronous>, transform_indices = @transform_6, window_bounds = array<i64: 1, 128>}, {pipeline_mode = #tpu.pipeline_mode<synchronous>, transform_indices = @transform_7, window_bounds = array<i64: 1, 128>}, {transform_indices = @transform_8, window_bounds = array<i64: 16, 128>}]} {
    %c0 = arith.constant 0 : index
    %c0_0 = arith.constant 0 : index
    %0 = vector.load %arg1[%c0, %c0_0] : memref<16x128xf32, #tpu.memory_space<vmem>>, vector<16x128xf32>
    %c0_1 = arith.constant 0 : index
    %c0_2 = arith.constant 0 : index
    %1 = vector.load %arg2[%c0_1, %c0_2] : memref<128x128xf32, #tpu.memory_space<vmem>>, vector<128x128xf32>
    %cst = arith.constant dense<0.000000e+00> : vector<16x128xf32>
    %2 = tpu.matmul %0, %1, %cst {dimension_numbers = #tpu.dot_dimension_numbers<[1], [0], [0], [1], [0, 0, 1, 1], [], []>} : vector<16x128xf32>, vector<128x128xf32>, vector<16x128xf32> -> vector<16x128xf32>
    %c0_3 = arith.constant 0 : index
    %c0_4 = arith.constant 0 : index
    %3 = vector.load %arg3[%c0_3, %c0_4] : memref<1x128xf32, #tpu.memory_space<vmem>>, vector<1x128xf32>
    %4 = vector.broadcast %3 : vector<1x128xf32> to vector<16x128xf32>
    %5 = arith.addf %2, %4 : vector<16x128xf32>
    %cst_5 = arith.constant 5.000000e-01 : f32
    %6 = vector.broadcast %cst_5 : f32 to vector<16x128xf32>
    %7 = arith.mulf %5, %6 : vector<16x128xf32>
    %cst_6 = arith.constant 0.707106769 : f32
    %8 = vector.broadcast %cst_6 : f32 to vector<16x128xf32>
    %9 = arith.mulf %5, %8 : vector<16x128xf32>
    %10 = math.erf %9 : vector<16x128xf32>
    %cst_7 = arith.constant 1.000000e+00 : f32
    %11 = vector.broadcast %cst_7 : f32 to vector<16x128xf32>
    %12 = arith.addf %11, %10 : vector<16x128xf32>
    %13 = arith.mulf %7, %12 : vector<16x128xf32>
    %c0_8 = arith.constant 0 : index
    %c0_9 = arith.constant 0 : index
    %14 = vector.load %arg4[%c0_8, %c0_9] : memref<128x128xf32, #tpu.memory_space<vmem>>, vector<128x128xf32>
    %cst_10 = arith.constant dense<0.000000e+00> : vector<16x128xf32>
    %15 = tpu.matmul %13, %14, %cst_10 {dimension_numbers = #tpu.dot_dimension_numbers<[1], [0], [0], [1], [0, 0, 1, 1], [], []>} : vector<16x128xf32>, vector<128x128xf32>, vector<16x128xf32> -> vector<16x128xf32>
    %c0_11 = arith.constant 0 : index
    %c0_12 = arith.constant 0 : index
    %16 = vector.load %arg5[%c0_11, %c0_12] : memref<1x128xf32, #tpu.memory_space<vmem>>, vector<1x128xf32>
    %17 = vector.broadcast %16 : vector<1x128xf32> to vector<16x128xf32>
    %18 = arith.addf %15, %17 : vector<16x128xf32>
    %c0_13 = arith.constant 0 : index
    %c0_14 = arith.constant 0 : index
    %19 = vector.load %arg6[%c0_13, %c0_14] : memref<1x128xf32, #tpu.memory_space<vmem>>, vector<1x128xf32>
    %c0_15 = arith.constant 0 : index
    %c0_16 = arith.constant 0 : index
    %20 = vector.load %arg7[%c0_15, %c0_16] : memref<1x128xf32, #tpu.memory_space<vmem>>, vector<1x128xf32>
    %c0_17 = arith.constant 0 : index
    %c0_18 = arith.constant 0 : index
    %21 = vector.load %arg8[%c0_17, %c0_18] : memref<1x128xf32, #tpu.memory_space<vmem>>, vector<1x128xf32>
    %22 = vector.broadcast %19 : vector<1x128xf32> to vector<16x128xf32>
    %23 = arith.mulf %22, %18 : vector<16x128xf32>
    %24 = arith.addf %0, %23 : vector<16x128xf32>
    %cst_19 = arith.constant dense<0.000000e+00> : vector<16xf32>
    %25 = vector.multi_reduction <add>, %24, %cst_19 [1] : vector<16x128xf32> to vector<16xf32>
    %26 = vector.shape_cast %25 : vector<16xf32> to vector<16x1xf32>
    %cst_20 = arith.constant 3.125000e-02 : f32
    %27 = vector.broadcast %cst_20 : f32 to vector<16x1xf32>
    %28 = arith.mulf %26, %27 : vector<16x1xf32>
    %29 = vector.broadcast %28 : vector<16x1xf32> to vector<16x128xf32>
    %30 = arith.subf %24, %29 : vector<16x128xf32>
    %31 = tpu.iota {dimensions = array<i32: 1>} : vector<1x128xi32>
    %c32_i32 = arith.constant 32 : i32
    %32 = vector.broadcast %c32_i32 : i32 to vector<1x128xi32>
    %33 = arith.cmpi slt, %31, %32 : vector<1x128xi32>
    %cst_21 = arith.constant 0.000000e+00 : f32
    %34 = vector.shape_cast %33 : vector<1x128xi1> to vector<1x128xi1>
    %35 = vector.broadcast %34 : vector<1x128xi1> to vector<16x128xi1>
    %36 = vector.broadcast %cst_21 : f32 to vector<16x128xf32>
    %37 = arith.select %35, %30, %36 : vector<16x128xi1>, vector<16x128xf32>
    %38 = arith.mulf %37, %37 : vector<16x128xf32>
    %cst_22 = arith.constant dense<0.000000e+00> : vector<16xf32>
    %39 = vector.multi_reduction <add>, %38, %cst_22 [1] : vector<16x128xf32> to vector<16xf32>
    %40 = vector.shape_cast %39 : vector<16xf32> to vector<16x1xf32>
    %cst_23 = arith.constant 3.125000e-02 : f32
    %41 = vector.broadcast %cst_23 : f32 to vector<16x1xf32>
    %42 = arith.mulf %40, %41 : vector<16x1xf32>
    %cst_24 = arith.constant 9.99999974E-6 : f32
    %43 = vector.broadcast %cst_24 : f32 to vector<16x1xf32>
    %44 = arith.addf %42, %43 : vector<16x1xf32>
    %45 = math.rsqrt %44 : vector<16x1xf32>
    %46 = vector.broadcast %45 : vector<16x1xf32> to vector<16x128xf32>
    %47 = arith.mulf %30, %46 : vector<16x128xf32>
    %48 = vector.broadcast %20 : vector<1x128xf32> to vector<16x128xf32>
    %49 = arith.mulf %47, %48 : vector<16x128xf32>
    %50 = vector.broadcast %21 : vector<1x128xf32> to vector<16x128xf32>
    %51 = arith.addf %49, %50 : vector<16x128xf32>
    %c0_25 = arith.constant 0 : index
    %c0_26 = arith.constant 0 : index
    %52 = vector.load %arg9[%c0_25, %c0_26] : memref<16x128xf32, #tpu.memory_space<vmem>>, vector<16x128xf32>
    tpu.vector_store %arg9[%c0_25, %c0_26], %51 {strides = array<i32>} : memref<16x128xf32, #tpu.memory_space<vmem>>, vector<16x128xf32>,
    return
  }
  func.func @transform_0(%arg0: i32) -> (i32, i32) {
    %c0_i32 = arith.constant 0 : i32
    %c0_i32_0 = arith.constant 0 : i32
    return %arg0, %c0_i32 : i32, i32
  }
  func.func @transform_1(%arg0: i32) -> (i32, i32) {
    %c0_i32 = arith.constant 0 : i32
    %c0_i32_0 = arith.constant 0 : i32
    %c0_i32_1 = arith.constant 0 : i32
    return %c0_i32, %c0_i32_0 : i32, i32
  }
  func.func @transform_2(%arg0: i32) -> (i32, i32) {
    %c0_i32 = arith.constant 0 : i32
    %c0_i32_0 = arith.constant 0 : i32
    %c0_i32_1 = arith.constant 0 : i32
    return %c0_i32, %c0_i32_0 : i32, i32
  }
  func.func @transform_3(%arg0: i32) -> (i32, i32) {
    %c0_i32 = arith.constant 0 : i32
    %c0_i32_0 = arith.constant 0 : i32
    %c0_i32_1 = arith.constant 0 : i32
    return %c0_i32, %c0_i32_0 : i32, i32
  }
  func.func @transform_4(%arg0: i32) -> (i32, i32) {
    %c0_i32 = arith.constant 0 : i32
    %c0_i32_0 = arith.constant 0 : i32
    %c0_i32_1 = arith.constant 0 : i32
    return %c0_i32, %c0_i32_0 : i32, i32
  }
  func.func @transform_5(%arg0: i32) -> (i32, i32) {
    %c0_i32 = arith.constant 0 : i32
    %c0_i32_0 = arith.constant 0 : i32
    %c0_i32_1 = arith.constant 0 : i32
    return %c0_i32, %c0_i32_0 : i32, i32
  }
  func.func @transform_6(%arg0: i32) -> (i32, i32) {
    %c0_i32 = arith.constant 0 : i32
    %c0_i32_0 = arith.constant 0 : i32
    %c0_i32_1 = arith.constant 0 : i32
    return %c0_i32, %c0_i32_0 : i32, i32
  }
  func.func @transform_7(%arg0: i32) -> (i32, i32) {
    %c0_i32 = arith.constant 0 : i32
    %c0_i32_0 = arith.constant 0 : i32
    %c0_i32_1 = arith.constant 0 : i32
    return %c0_i32, %c0_i32_0 : i32, i32
  }
  func.func @transform_8(%arg0: i32) -> (i32, i32) {
    %c0_i32 = arith.constant 0 : i32
    %c0_i32_0 = arith.constant 0 : i32
    return %arg0, %c0_i32 : i32, i32
  }
}

</mosaic_0001>

<bundles_post_ra>
// kernel: residual_mlp_block.1
= control target key start
LH: loop header
LB: loop body
LE: loop exit
PB: predicated region body
PF: predicated region fallthrough
CT: control target
= control target key end

     0   :  { %s705_s0 = inlined_call_operand.vmem [shape: f32[16,128], index: 0, kind: input, shape index: {}]   ;;  %s706_s1 = inlined_call_operand.vmem [shape: f32[128,128], index: 1, kind: input, shape index: {}]   ;;  %s707_s2 = inlined_call_operand.vmem [shape: f32[1,128], index: 2, kind: input, shape index: {}]   ;;  %s708_s3 = inlined_call_operand.vmem [shape: f32[128,128], index: 3, kind: input, shape index: {}]   ;;  %s709_s4 = inlined_call_operand.vmem [shape: f32[1,128], index: 4, kind: input, shape index: {}]   ;;  %s710_s5 = inlined_call_operand.vmem [shape: f32[1,128], index: 5, kind: input, shape index: {}]   ;;  %s711_s6 = inlined_call_operand.vmem [shape: f32[1,128], index: 6, kind: input, shape index: {}]   ;;  %s712_s7 = inlined_call_operand.vmem [shape: f32[1,128], index: 7, kind: input, shape index: {}]   ;;  %s713_s8 = inlined_call_operand.hbm [shape: f32[16,128], index: 8, kind: output, shape index: {}]  }
   0x1   :  { %v32_v0 = vld [vmem:[%s706_s1] sm:$0xff]  ;;  %v33_v1 = vld [vmem:[%s706_s1 + $0x8] sm:$0xff]  ;;  %v34_v2 = vld [vmem:[%s706_s1 + $0x10] sm:$0xff] }
   0x2   :  { %v425_v3 = vpack.c.bf16 %v33_v1, %v32_v0  ;;  %v35_v4 = vld [vmem:[%s706_s1 + $0x18] sm:$0xff]  ;;  %v36_v6 = vld [vmem:[%s706_s1 + $0x20] sm:$0xff]  ;;  %v37_v7 = vld [vmem:[%s706_s1 + $0x28] sm:$0xff] }
   0x3   :  { %v429_v5 = vpack.c.bf16 %v35_v4, %v34_v2  ;;  %v433_v8 = vpack.c.bf16 %v37_v7, %v36_v6  ;;  %v38_v9 = vld [vmem:[%s706_s1 + $0x30] sm:$0xff]  ;;  %v39_v10 = vld [vmem:[%s706_s1 + $0x38] sm:$0xff]  ;;  %v599_v11 = vld [vmem:[%s705_s0] sm:$0xff] }
   0x4   :  { %426 = vmatprep.subr.bf16.mxu0 %v425_v3  ;;  %387 = vmatprep.mubr.f32.mxu0 %v599_v11  ;;  %v140_v12 = vld [vmem:[%s708_s3] sm:$0xff]  ;;  %v141_v13 = vld [vmem:[%s708_s3 + $0x8] sm:$0xff]  ;;  %v142_v14 = vld [vmem:[%s708_s3 + $0x10] sm:$0xff] }
   0x5   :  { %428 = vmatpush3.bf16.msra.mxu0 %v425_v3  ;;  %v457_v15 = vpack.c.bf16 %v141_v13, %v140_v12  ;;  %v143_v16 = vld [vmem:[%s708_s3 + $0x18] sm:$0xff]  ;;  %v144_v18 = vld [vmem:[%s708_s3 + $0x20] sm:$0xff]  ;;  %v145_v19 = vld [vmem:[%s708_s3 + $0x28] sm:$0xff] }
   0x6   :  { %430 = vmatprep.subr.bf16.mxu0 %v429_v5  ;;  %v461_v17 = vpack.c.bf16 %v143_v16, %v142_v14 }
   0x9   :  { %432 = vmatpush3.bf16.msra.mxu0 %v429_v5 }
   0xa   :  { %13 = vsyncpa [#allocation3], 0  ;;  %434 = vmatprep.subr.bf16.mxu0 %v433_v8  ;;  %v437_v20 = vpack.c.bf16 %v39_v10, %v38_v9  ;;  %458 = vmatprep.subr.bf16.mxu1 %v457_v15  ;;  %v40_v21 = vld [vmem:[%s706_s1 + $0x40] sm:$0xff]  ;;  %v41_v22 = vld [vmem:[%s706_s1 + $0x48] sm:$0xff]  ;;  %v465_v23 = vpack.c.bf16 %v145_v19, %v144_v18  ;;  %v259_v12 = vlaneseq  ;;  %s524_s11 = smov [#allocation2]  }
   0xb   :  { %460 = vmatpush3.bf16.msra.mxu1 %v457_v15  ;;  %v441_v24 = vpack.c.bf16 %v41_v22, %v40_v21  ;;  %v42_v25 = vld [vmem:[%s706_s1 + $0x50] sm:$0xff]  ;;  %v43_v26 = vld [vmem:[%s706_s1 + $0x58] sm:$0xff]  ;;  %v44_v28 = vld [vmem:[%s706_s1 + $0x60] sm:$0xff]  ;;  %s303_s12 = sshll.u32 %s524_s11, 4  ;;  %s304_s12 = int_to_ptr.vmem [resolvable:$true] %s303_s12 }
   0xc   :  { %462 = vmatprep.subr.bf16.mxu1 %v461_v17  ;;  %v445_v27 = vpack.c.bf16 %v43_v26, %v42_v25  ;;  %v45_v29 = vld [vmem:[%s706_s1 + $0x68] sm:$0xff]  ;;  %v46_v31 = vld [vmem:[%s706_s1 + $0x70] sm:$0xff]  ;;  %v47_v32 = vld [vmem:[%s706_s1 + $0x78] sm:$0xff]  ;;  %v260_v13 = vand.u32 127, %v259_v12  ;;  %s500_s1 = scalar_lea.vmem %s304_s12, 256  ;;  %p505_p1 = scmp.lt.s32.totalorder %s304_s12, %s304_s12 }
   0xd   :  { %436 = vmatpush3.bf16.msra.mxu0 %v433_v8  ;;  %v449_v30 = vpack.c.bf16 %v45_v29, %v44_v28  ;;  %v453_v33 = vpack.c.bf16 %v47_v32, %v46_v31  ;;  %v31_v34 = vld [vmem:[%s705_s0 + $0x8] sm:$0xff]  ;;  %v146_v35 = vld [vmem:[%s708_s3 + $0x30] sm:$0xff]  ;;  %v147_v36 = vld [vmem:[%s708_s3 + $0x38] sm:$0xff]  ;;  %p501_p0 = scmp.ne.s32.totalorder %s304_s12, %s500_s1  ;;  %p506_p2 = scmp.lt.s32.totalorder %s500_s1, %s500_s1 }
   0xe   :  { %438 = vmatprep.subr.bf16.mxu0 %v437_v20  ;;  %v469_v37 = vpack.c.bf16 %v147_v36, %v146_v35  ;;  %v148_v38 = vld [vmem:[%s708_s3 + $0x40] sm:$0xff]  ;;  %v149_v39 = vld [vmem:[%s708_s3 + $0x48] sm:$0xff]  ;;  %v150_v41 = vld [vmem:[%s708_s3 + $0x50] sm:$0xff]  ;;  %vm261_vm0 = vcmp.lt.s32.totalorder %v260_v13, 32 }
   0xf   :  { %464 = vmatpush3.bf16.msra.mxu1 %v461_v17  ;;  %v473_v40 = vpack.c.bf16 %v149_v39, %v148_v38  ;;  %v151_v42 = vld [vmem:[%s708_s3 + $0x58] sm:$0xff]  ;;  %v152_v44 = vld [vmem:[%s708_s3 + $0x60] sm:$0xff]  ;;  %v153_v45 = vld [vmem:[%s708_s3 + $0x68] sm:$0xff]  ;;  %p507_p3 = por %p506_p2, %p505_p1 }
  0x10   :  { %466 = vmatprep.subr.bf16.mxu1 %v465_v23  ;;  %v477_v43 = vpack.c.bf16 %v151_v42, %v150_v41  ;;  %v481_v46 = vpack.c.bf16 %v153_v45, %v152_v44  ;;  %v154_v47 = vld [vmem:[%s708_s3 + $0x70] sm:$0xff]  ;;  %v155_v48 = vld [vmem:[%s708_s3 + $0x78] sm:$0xff]  ;;  %v314_v50 = vld [vmem:[%s707_s2] ss:$0 sm:$0xff] }
  0x11   :  { %440 = vmatpush3.bf16.msra.mxu0 %v437_v20  ;;  %v485_v49 = vpack.c.bf16 %v155_v48, %v154_v47  ;;  %v315_v1 = vld [vmem:[%s709_s4] ss:$0 sm:$0xff]  ;;  %p508_p4 = pnand %p507_p3, %p501_p0 }
  0x12   :  { %442 = vmatprep.subr.bf16.mxu0 %v441_v24  ;;  %v316_v3 = vld [vmem:[%s710_s5] ss:$0 sm:$0xff] }
  0x13   :  { %468 = vmatpush3.bf16.msra.mxu1 %v465_v23  ;;  %v318_v32 = vld [vmem:[%s712_s7] ss:$0 sm:$0xff] }
  0x14   :  { %470 = vmatprep.subr.bf16.mxu1 %v469_v37 }
  0x15   :  { %444 = vmatpush3.bf16.msra.mxu0 %v441_v24 }
  0x16   :  { %446 = vmatprep.subr.bf16.mxu0 %v445_v27 }
  0x17   :  { %472 = vmatpush3.bf16.msra.mxu1 %v469_v37 }
  0x18   :  { %474 = vmatprep.subr.bf16.mxu1 %v473_v40 }
  0x19   :  { %448 = vmatpush3.bf16.msra.mxu0 %v445_v27 }
  0x1a   :  { %450 = vmatprep.subr.bf16.mxu0 %v449_v30 }
  0x1b   :  { %476 = vmatpush3.bf16.msra.mxu1 %v473_v40 }
  0x1c   :  { %478 = vmatprep.subr.bf16.mxu1 %v477_v43 }
  0x1d   :  { %452 = vmatpush3.bf16.msra.mxu0 %v449_v30  ;;  %v317_v30 = vld [vmem:[%s711_s6] ss:$0 sm:$0xff] }
  0x1e   :  { %454 = vmatprep.subr.bf16.mxu0 %v453_v33 }
  0x1f   :  { %480 = vmatpush3.bf16.msra.mxu1 %v477_v43 }
  0x20   :  { %482 = vmatprep.subr.bf16.mxu1 %v481_v46 }
  0x21   :  { %456 = vmatpush3.bf16.msra.mxu0 %v453_v33 }
  0x23   :  { %484 = vmatpush3.bf16.msra.mxu1 %v481_v46 }
  0x24   :  { %388 = vmatmul.mubr.f32.vlgmr.msra.gmra.mrb[0].mxu0 %v31_v34  ;;  %486 = vmatprep.subr.bf16.mxu1 %v485_v49 }
  0x27   :  { %488 = vmatpush3.bf16.msra.mxu1 %v485_v49 }
  0xf7   :  { %v389_v51 = vpop.f32.mrb[0].mxu0 }
  0xf8   :  { %v127_v52 = vadd.f32 %v389_v51, %v314_v50  ;;  %v121_v53 = vpop.f32.mrb[1].mxu0 }
  0xf9   :  { %v122_v54 = vadd.f32 %v314_v50, %v121_v53 }
  0xfa   :  { %v133_v55 = vmul.f32 0.70710677, %v127_v52  ;;  %v131_v62 = vmul.f32 0.5, %v127_v52 }
  0xfb   :  { %v132_v56 = vmul.f32 0.70710677, %v122_v54  ;;  %v130_v60 = vmul.f32 0.5, %v122_v54 }
  0xfc   :  { %492 = verf.f32 %v133_v55 }
  0xfd   :  { %494 = verf.f32 %v132_v56 }
 0x106   :  { %v493_v57 = vpop.eup %492 }
 0x107   :  { %v495_v58 = vpop.eup %494  ;;  %v137_v59 = vadd.f32 1.0, %v493_v57 }
 0x108   :  { %v136_v61 = vadd.f32 1.0, %v495_v58 }
 0x109   :  { %v139_v0 = vmul.f32 %v137_v59, %v131_v62 }
 0x10a   :  { %v138_v63 = vmul.f32 %v136_v61, %v130_v60 }
 0x10c   :  { %422 = vmatprep.mubr.f32.mxu1 %v138_v63 }
 0x10d   :  { %423 = vmatmul.mubr.f32.vlgmr.msra.gmra.mrb[0].mxu1 %v139_v0 }
 0x1e0   :  { %v424_v2 = vpop.f32.mrb[0].mxu1 }
 0x1e1   :  { %v229_v4 = vpop.f32.mrb[1].mxu1  ;;  %v235_v5 = vadd.f32 %v424_v2, %v315_v1 }
 0x1e2   :  { %v230_v6 = vadd.f32 %v315_v1, %v229_v4 }
 0x1e3   :  { %v248_v8 = vmul.f32 %v316_v3, %v235_v5 }
 0x1e4   :  { %v247_v7 = vmul.f32 %v316_v3, %v230_v6 }
 0x1e5   :  { %v250_v10 = vadd.f32 %v248_v8, %v31_v34 }
 0x1e6   :  { %v249_v9 = vadd.f32 %v247_v7, %v599_v11 }
 0x1e8   :  { %251 = vadd.xlane.f32.xlu0 %v249_v9 }
 0x1ec   :  { %253 = vadd.xlane.f32.xlu0 %v250_v10 }
 0x275   :  { %v252_v14 = vpop.xlane.xlu0 %251 }
 0x276   :  { %v255_v15 = vmul.f32 0.03125, %v252_v14 }
 0x278   :  { %v257_v16 = vsub.f32 %v249_v9, %v255_v15 }
 0x279   :  { %v254_v17 = vpop.xlane.xlu0 %253 }
 0x27a   :  { %v256_v18 = vmul.f32 0.03125, %v254_v17  ;;  %v264_v19 = vsel %vm261_vm0, %v257_v16, 0.0 }
 0x27b   :  { %v266_v20 = vmul.f32 %v264_v19, %v264_v19 }
 0x27c   :  { %v258_v21 = vsub.f32 %v250_v10, %v256_v18 }
 0x27d   :  { %268 = vadd.xlane.f32.xlu1 %v266_v20 }
 0x27e   :  { %v265_v22 = vsel %vm261_vm0, %v258_v21, 0.0 }
 0x27f   :  { %v267_v23 = vmul.f32 %v265_v22, %v265_v22 }
 0x281   :  { %270 = vadd.xlane.f32.xlu1 %v267_v23 }
 0x30a   :  { %v269_v24 = vpop.xlane.xlu1 %268 }
 0x30b   :  { %v272_v11 = vmul.f32 0.03125, %v269_v24 }
 0x30d   :  { %v274_v25 = vadd.f32 1e-05, %v272_v11 }
 0x30e   :  { %v271_v26 = vpop.xlane.xlu1 %270 }
 0x30f   :  { %496 = vrsqrt.f32 %v274_v25  ;;  %v273_v27 = vmul.f32 0.03125, %v271_v26 }
 0x311   :  { %v275_v28 = vadd.f32 1e-05, %v273_v27 }
 0x313   :  { %498 = vrsqrt.f32 %v275_v28 }
 0x319   :  { %v497_v29 = vpop.eup %496 }
 0x31a   :  { %v278_v31 = vmul.f32 %v497_v29, %v257_v16 }
 0x31c   :  { %v286_v33 = vmul.f32 %v317_v30, %v278_v31 }
 0x31d   :  { %v499_v34 = vpop.eup %498 }
 0x31e   :  { %v279_v35 = vmul.f32 %v499_v34, %v258_v21  ;;  %v294_v36 = vadd.f32 %v318_v32, %v286_v33 }
 0x320   :  { %v287_v37 = vmul.f32 %v317_v30, %v279_v35  ;;  %296 = vst [vmem:[#allocation2] sm:$0xff] %v294_v36 }
 0x322   :  { %v295_v38 = vadd.f32 %v318_v32, %v287_v37 }
 0x324   :  { %297 = vst [vmem:[#allocation2 + $0x8] sm:$0xff] %v295_v38 }
 0x325   :  { %511 = shalt.err (!%p508_p4)
}
 0x326   :  { %s512_s13 = scalar_lea.hbm %s713_s8, 256 }
 0x327   :  { %p513_p5 = scmp.ne.s32.totalorder %s713_s8, %s512_s13  ;;  %p516_p6 = scmp.lt.u32.totalorder %s512_s13, %s713_s8 }
 0x329   :  { %p518_p7 = pnand %p516_p6, %p513_p5 }
 0x32b   :  { %521 = shalt.err (!%p518_p7)
}
 0x32c   :  { %s525_s17 = smov 128   ;;  %s526_s18 = smov 8  }
 0x32d   :  { %309 = dma.vmem_to_hbm [thread:$0]  %s304_s12, 256, %s713_s8, [#allocation3], %s525_s17, %s525_s17, %s526_s18  }
 0x32e   :  { %522 = dma.done.wait [#allocation3], 256  }
 0x32f   :  { %523 = vsyncadd [#allocation3], 4294967040 }
 0x330   :  { %313 = vsyncpa [#allocation3], 1 }

</bundles_post_ra>
